<compile_context>
chip_gen: v7x
topology: tpu7x:2x2x1
jax: 0.10.0
libtpu: 0.0.40
codegen_flags: <defaults>
</compile_context>

<pallas_src>
import jax
import jax.numpy as jnp
from jax.experimental import pallas as pl
from jax.experimental.pallas import tpu as pltpu


def _round_up(n, m):
    return ((n + m - 1) // m) * m


def residual_layer_kernel(x_ref, w1_ref, b1_ref, w2_ref, b2_ref, o_ref):
    # Two MXU matmuls (native-dtype operands, f32 accumulate) + VPU relu/add, fused.
    x = x_ref[...]
    h = jnp.dot(x, w1_ref[...], preferred_element_type=jnp.float32)
    h = jnp.maximum(h + b1_ref[...].astype(jnp.float32), 0.0)
    h = h.astype(w2_ref.dtype)  # keep the second matmul on the native (e.g. bf16) MXU path
    y = jnp.dot(h, w2_ref[...], preferred_element_type=jnp.float32)
    y = jnp.maximum(y + b2_ref[...].astype(jnp.float32), 0.0)
    y = y + x.astype(jnp.float32)  # residual add in f32
    o_ref[...] = y.astype(o_ref.dtype)


def residual_layer(x, w1, b1, w2, b2, *, tile_b=None):
    """Computes relu(relu(x @ w1 + b1) @ w2 + b2) + x with weights stored [in, out]."""
    B, D = x.shape
    assert w1.shape == (D, D) and w2.shape == (D, D), "residual add requires in_dim == out_dim"

    # --- Lane-dense padding: feature dim up to a multiple of 128 (unmasked vst). ---
    D_p = _round_up(max(D, 128), 128)
    itemsize = jnp.dtype(x.dtype).itemsize
    w_itemsize = jnp.dtype(w1.dtype).itemsize

    # --- Batch tile: large enough to pipeline / feed the MXU, bounded by a VMEM budget
    #     that leaves headroom under v7x's 64 MiB. Weights + biases are double-buffered
    #     by the pipeline, x/out tiles are double-buffered, plus f32 temporaries. ---
    if tile_b is None:
        tile_b = min(512, _round_up(B, 8))
    tile_b = max(8, _round_up(tile_b, 8))
    budget = 48 * 1024 * 1024
    w_bytes = 2 * 2 * (D_p * D_p + D_p) * w_itemsize
    per_row = D_p * (4 * itemsize + 3 * 4)
    if budget > w_bytes:
        max_rows = max(8, (((budget - w_bytes) // per_row) // 8) * 8)
    else:
        max_rows = 8
    tile_b = max(8, min(tile_b, max_rows))
    # TODO(synk): add a K-tiled reduction (extra 'arbitrary' grid axis + f32 scratch
    # accumulator, or pltpu.emit_pipeline over HBM-resident weights) once D is too large
    # for resident weights in VMEM.

    B_p = _round_up(B, tile_b)
    grid = (B_p // tile_b,)

    # --- Zero padding: zero rows/columns stay zero through matmul/relu/residual. ---
    x_p = jnp.pad(x, ((0, B_p - B), (0, D_p - D)))
    w1_p = jnp.pad(w1, ((0, D_p - D), (0, D_p - D)))
    w2_p = jnp.pad(w2, ((0, D_p - D), (0, D_p - D)))
    b1_p = jnp.pad(b1.reshape(1, D), ((0, 0), (0, D_p - D)))
    b2_p = jnp.pad(b2.reshape(1, D), ((0, 0), (0, D_p - D)))

    vmem_need = w_bytes + tile_b * per_row
    vmem_limit = int(min(60 * 1024 * 1024, max(32 * 1024 * 1024, 1.5 * vmem_need)))

    flops = 4 * B_p * D_p * D_p  # two matmuls, 2*M*K*N each
    bytes_accessed = 2 * B_p * D_p * itemsize + 2 * (D_p * D_p + D_p) * w_itemsize

    out_p = pl.pallas_call(
        residual_layer_kernel,
        out_shape=jax.ShapeDtypeStruct((B_p, D_p), x.dtype),
        grid_spec=pltpu.PrefetchScalarGridSpec(
            num_scalar_prefetch=0,
            grid=grid,
            in_specs=[
                pl.BlockSpec((tile_b, D_p), lambda i: (i, 0)),  # x tile (pipelined over batch)
                pl.BlockSpec((D_p, D_p), lambda i: (0, 0)),     # W1 (resident, fetched once)
                pl.BlockSpec((1, D_p), lambda i: (0, 0)),       # b1
                pl.BlockSpec((D_p, D_p), lambda i: (0, 0)),     # W2 (resident, fetched once)
                pl.BlockSpec((1, D_p), lambda i: (0, 0)),       # b2
            ],
            out_specs=pl.BlockSpec((tile_b, D_p), lambda i: (i, 0)),
        ),
        compiler_params=pltpu.CompilerParams(
            dimension_semantics=("parallel",),  # batch tiles shard across TensorCores
            vmem_limit_bytes=vmem_limit,
        ),
        cost_estimate=pl.CostEstimate(
            flops=flops, transcendentals=0, bytes_accessed=bytes_accessed
        ),
        input_output_aliases={0: 0},  # reuse the padded-x HBM buffer for the output
    )(x_p, w1_p, b1_p, w2_p, b2_p)

    return out_p[:B, :D]


def reference(x, w1, b1, w2, b2):
    h = jnp.maximum(x @ w1 + b1, 0.0)
    y = jnp.maximum(h @ w2 + b2, 0.0)
    return y + x


if __name__ == "__main__":
    # Module defaults: in_dim == out_dim == 100 (residual add requires square layers).
    batch, dim = 8, 100

    key = jax.random.PRNGKey(0)
    k_x, k_w1, k_b1, k_w2, k_b2 = jax.random.split(key, 5)

    # PyTorch-Linear-style init: U(-1/sqrt(fan_in), 1/sqrt(fan_in)).
    bound = 1.0 / (dim ** 0.5)
    x = jax.random.normal(k_x, (batch, dim), dtype=jnp.float32)
    # Weights stored as [in_features, out_features] (transpose of torch's [out, in]).
    w1 = jax.random.uniform(k_w1, (dim, dim), jnp.float32, -bound, bound)
    b1 = jax.random.uniform(k_b1, (dim,), jnp.float32, -bound, bound)
    w2 = jax.random.uniform(k_w2, (dim, dim), jnp.float32, -bound, bound)
    b2 = jax.random.uniform(k_b2, (dim,), jnp.float32, -bound, bound)

    fn = jax.jit(residual_layer)
    out = jax.block_until_ready(fn(x, w1, b1, w2, b2))

    ref = reference(x, w1, b1, w2, b2)
    assert out.shape == (batch, dim)
    assert jnp.allclose(out, ref, atol=2e-5, rtol=2e-5), "mismatch vs reference"

    print("KERNEL_OK")
</pallas_src>

<mosaic_0001>
module attributes {stable_mosaic.version = 11 : i64} {
  func.func @residual_layer_kernel(%arg0: i32, %arg1: memref<8x128xf32, #tpu.memory_space<vmem>>, %arg2: memref<128x128xf32, #tpu.memory_space<vmem>>, %arg3: memref<1x128xf32, #tpu.memory_space<vmem>>, %arg4: memref<128x128xf32, #tpu.memory_space<vmem>>, %arg5: memref<1x128xf32, #tpu.memory_space<vmem>>, %arg6: memref<8x128xf32, #tpu.memory_space<vmem>>) attributes {dimension_semantics = [#tpu.dimension_semantics<parallel>], iteration_bounds = array<i64: 1>, scalar_prefetch = 0 : i64, scratch_operands = 0 : i64, tpu.core_type = #tpu.core_type<tc>, window_params = [{transform_indices = @transform_0, window_bounds = array<i64: 8, 128>}, {pipeline_mode = #tpu.pipeline_mode<synchronous>, transform_indices = @transform_1, window_bounds = array<i64: 128, 128>}, {pipeline_mode = #tpu.pipeline_mode<synchronous>, transform_indices = @transform_2, window_bounds = array<i64: 1, 128>}, {pipeline_mode = #tpu.pipeline_mode<synchronous>, transform_indices = @transform_3, window_bounds = array<i64: 128, 128>}, {pipeline_mode = #tpu.pipeline_mode<synchronous>, transform_indices = @transform_4, window_bounds = array<i64: 1, 128>}, {transform_indices = @transform_5, window_bounds = array<i64: 8, 128>}]} {
    %c0 = arith.constant 0 : index
    %c0_0 = arith.constant 0 : index
    %0 = vector.load %arg1[%c0, %c0_0] : memref<8x128xf32, #tpu.memory_space<vmem>>, vector<8x128xf32>
    %c0_1 = arith.constant 0 : index
    %c0_2 = arith.constant 0 : index
    %1 = vector.load %arg2[%c0_1, %c0_2] : memref<128x128xf32, #tpu.memory_space<vmem>>, vector<128x128xf32>
    %cst = arith.constant dense<0.000000e+00> : vector<8x128xf32>
    %2 = tpu.matmul %0, %1, %cst {dimension_numbers = #tpu.dot_dimension_numbers<[1], [0], [0], [1], [0, 0, 1, 1], [], []>} : vector<8x128xf32>, vector<128x128xf32>, vector<8x128xf32> -> vector<8x128xf32>
    %c0_3 = arith.constant 0 : index
    %c0_4 = arith.constant 0 : index
    %3 = vector.load %arg3[%c0_3, %c0_4] : memref<1x128xf32, #tpu.memory_space<vmem>>, vector<1x128xf32>
    %4 = vector.broadcast %3 : vector<1x128xf32> to vector<8x128xf32>
    %5 = arith.addf %2, %4 : vector<8x128xf32>
    %cst_5 = arith.constant 0.000000e+00 : f32
    %6 = vector.broadcast %cst_5 : f32 to vector<8x128xf32>
    %7 = arith.maximumf %5, %6 : vector<8x128xf32>
    %c0_6 = arith.constant 0 : index
    %c0_7 = arith.constant 0 : index
    %8 = vector.load %arg4[%c0_6, %c0_7] : memref<128x128xf32, #tpu.memory_space<vmem>>, vector<128x128xf32>
    %cst_8 = arith.constant dense<0.000000e+00> : vector<8x128xf32>
    %9 = tpu.matmul %7, %8, %cst_8 {dimension_numbers = #tpu.dot_dimension_numbers<[1], [0], [0], [1], [0, 0, 1, 1], [], []>} : vector<8x128xf32>, vector<128x128xf32>, vector<8x128xf32> -> vector<8x128xf32>
    %c0_9 = arith.constant 0 : index
    %c0_10 = arith.constant 0 : index
    %10 = vector.load %arg5[%c0_9, %c0_10] : memref<1x128xf32, #tpu.memory_space<vmem>>, vector<1x128xf32>
    %11 = vector.broadcast %10 : vector<1x128xf32> to vector<8x128xf32>
    %12 = arith.addf %9, %11 : vector<8x128xf32>
    %cst_11 = arith.constant 0.000000e+00 : f32
    %13 = vector.broadcast %cst_11 : f32 to vector<8x128xf32>
    %14 = arith.maximumf %12, %13 : vector<8x128xf32>
    %15 = arith.addf %14, %0 : vector<8x128xf32>
    %c0_12 = arith.constant 0 : index
    %c0_13 = arith.constant 0 : index
    %16 = vector.load %arg6[%c0_12, %c0_13] : memref<8x128xf32, #tpu.memory_space<vmem>>, vector<8x128xf32>
    tpu.vector_store %arg6[%c0_12, %c0_13], %15 {strides = array<i32>} : memref<8x128xf32, #tpu.memory_space<vmem>>, vector<8x128xf32>,
    return
  }
  func.func @transform_0(%arg0: i32) -> (i32, i32) {
    %c0_i32 = arith.constant 0 : i32
    %c0_i32_0 = arith.constant 0 : i32
    return %arg0, %c0_i32 : i32, i32
  }
  func.func @transform_1(%arg0: i32) -> (i32, i32) {
    %c0_i32 = arith.constant 0 : i32
    %c0_i32_0 = arith.constant 0 : i32
    %c0_i32_1 = arith.constant 0 : i32
    return %c0_i32, %c0_i32_0 : i32, i32
  }
  func.func @transform_2(%arg0: i32) -> (i32, i32) {
    %c0_i32 = arith.constant 0 : i32
    %c0_i32_0 = arith.constant 0 : i32
    %c0_i32_1 = arith.constant 0 : i32
    return %c0_i32, %c0_i32_0 : i32, i32
  }
  func.func @transform_3(%arg0: i32) -> (i32, i32) {
    %c0_i32 = arith.constant 0 : i32
    %c0_i32_0 = arith.constant 0 : i32
    %c0_i32_1 = arith.constant 0 : i32
    return %c0_i32, %c0_i32_0 : i32, i32
  }
  func.func @transform_4(%arg0: i32) -> (i32, i32) {
    %c0_i32 = arith.constant 0 : i32
    %c0_i32_0 = arith.constant 0 : i32
    %c0_i32_1 = arith.constant 0 : i32
    return %c0_i32, %c0_i32_0 : i32, i32
  }
  func.func @transform_5(%arg0: i32) -> (i32, i32) {
    %c0_i32 = arith.constant 0 : i32
    %c0_i32_0 = arith.constant 0 : i32
    return %arg0, %c0_i32 : i32, i32
  }
}

</mosaic_0001>

<bundles_post_ra>
// kernel: residual_layer.1
= control target key start
LH: loop header
LB: loop body
LE: loop exit
PB: predicated region body
PF: predicated region fallthrough
CT: control target
= control target key end

     0   :  { %v372_v0 = vmov 0.0|0.0   ;;  %vm373_vm0 = vmmov 0   ;;  %v374_v4 = vmov 0.0   ;;  %s529_s1 = inlined_call_operand.vmem [shape: f32[128,128], index: 1, kind: input, shape index: {}]   ;;  %s530_s3 = inlined_call_operand.vmem [shape: f32[128,128], index: 3, kind: input, shape index: {}]   ;;  %s531_s0 = inlined_call_operand.vmem [shape: f32[8,128], index: 0, kind: input, shape index: {}, may-alias: {0,5}]   ;;  %s532_s2 = inlined_call_operand.vmem [shape: f32[1,128], index: 2, kind: input, shape index: {}]   ;;  %s533_s4 = inlined_call_operand.vmem [shape: f32[1,128], index: 4, kind: input, shape index: {}]   ;;  %s534_s5 = inlined_call_operand.vmem [shape: f32[8,128], index: 5, kind: output, shape index: {}, may-alias: {0,5}]  }
   0x1   :  { %321 = vmatprep.subr.bf16.mxu0 %v372_v0  ;;  %v21_v1 = vld [vmem:[%s529_s1] sm:$0xff]  ;;  %v22_v2 = vld [vmem:[%s529_s1 + $0x8] sm:$0xff]  ;;  %v23_v3 = vld [vmem:[%s529_s1 + $0x10] sm:$0xff]  ;;  %283 = vmatprep.mubr.msk.f32.mxu0 %vm373_vm0, %v374_v4 }
   0x2   :  { %v322_v5 = vpack.c.bf16 %v22_v2, %v21_v1  ;;  %v24_v6 = vld [vmem:[%s529_s1 + $0x18] sm:$0xff]  ;;  %345 = vmatprep.subr.bf16.mxu1 %v372_v0  ;;  %318 = vmatprep.mubr.msk.f32.mxu1 %vm373_vm0, %v374_v4  ;;  %v25_v8 = vld [vmem:[%s529_s1 + $0x20] sm:$0xff]  ;;  %v26_v9 = vld [vmem:[%s529_s1 + $0x28] sm:$0xff] }
   0x3   :  { %v325_v7 = vpack.c.bf16 %v24_v6, %v23_v3  ;;  %v115_v10 = vld [vmem:[%s530_s3] sm:$0xff]  ;;  %v116_v11 = vld [vmem:[%s530_s3 + $0x8] sm:$0xff]  ;;  %v117_v12 = vld [vmem:[%s530_s3 + $0x10] sm:$0xff]  ;;  %v328_v14 = vpack.c.bf16 %v26_v9, %v25_v8 }
   0x4   :  { %323 = vmatpush3.bf16.msra.mxu0 %v322_v5  ;;  %v118_v13 = vld [vmem:[%s530_s3 + $0x18] sm:$0xff]  ;;  %v346_v15 = vpack.c.bf16 %v116_v11, %v115_v10  ;;  %v27_v16 = vld [vmem:[%s529_s1 + $0x30] sm:$0xff]  ;;  %v119_v19 = vld [vmem:[%s530_s3 + $0x20] sm:$0xff] }
   0x5   :  { %324 = vmatprep.subr.bf16.mxu0 %v372_v0  ;;  %v28_v17 = vld [vmem:[%s529_s1 + $0x38] sm:$0xff]  ;;  %v349_v18 = vpack.c.bf16 %v118_v13, %v117_v12  ;;  %v120_v20 = vld [vmem:[%s530_s3 + $0x28] sm:$0xff]  ;;  %v29_v22 = vld [vmem:[%s529_s1 + $0x40] sm:$0xff] }
   0x6   :  { %347 = vmatpush3.bf16.msra.mxu1 %v346_v15  ;;  %v331_v21 = vpack.c.bf16 %v28_v17, %v27_v16  ;;  %v30_v23 = vld [vmem:[%s529_s1 + $0x48] sm:$0xff]  ;;  %v352_v24 = vpack.c.bf16 %v120_v20, %v119_v19  ;;  %v121_v25 = vld [vmem:[%s530_s3 + $0x30] sm:$0xff]  ;;  %v122_v26 = vld [vmem:[%s530_s3 + $0x38] sm:$0xff] }
   0x7   :  { %348 = vmatprep.subr.bf16.mxu1 %v372_v0  ;;  %v334_v27 = vpack.c.bf16 %v30_v23, %v29_v22  ;;  %v31_v28 = vld [vmem:[%s529_s1 + $0x50] sm:$0xff]  ;;  %v32_v29 = vld [vmem:[%s529_s1 + $0x58] sm:$0xff]  ;;  %v355_v30 = vpack.c.bf16 %v122_v26, %v121_v25  ;;  %v123_v31 = vld [vmem:[%s530_s3 + $0x40] sm:$0xff] }
   0x8   :  { %326 = vmatpush3.bf16.msra.mxu0 %v325_v7  ;;  %v124_v32 = vld [vmem:[%s530_s3 + $0x48] sm:$0xff]  ;;  %v337_v33 = vpack.c.bf16 %v32_v29, %v31_v28  ;;  %v33_v34 = vld [vmem:[%s529_s1 + $0x60] sm:$0xff]  ;;  %v125_v37 = vld [vmem:[%s530_s3 + $0x50] sm:$0xff] }
   0x9   :  { %327 = vmatprep.subr.bf16.mxu0 %v372_v0  ;;  %v34_v35 = vld [vmem:[%s529_s1 + $0x68] sm:$0xff]  ;;  %v358_v36 = vpack.c.bf16 %v124_v32, %v123_v31  ;;  %v126_v38 = vld [vmem:[%s530_s3 + $0x58] sm:$0xff]  ;;  %v35_v40 = vld [vmem:[%s529_s1 + $0x70] sm:$0xff] }
   0xa   :  { %350 = vmatpush3.bf16.msra.mxu1 %v349_v18  ;;  %v340_v39 = vpack.c.bf16 %v34_v35, %v33_v34  ;;  %v36_v41 = vld [vmem:[%s529_s1 + $0x78] sm:$0xff]  ;;  %v361_v42 = vpack.c.bf16 %v126_v38, %v125_v37  ;;  %v127_v43 = vld [vmem:[%s530_s3 + $0x60] sm:$0xff]  ;;  %v128_v44 = vld [vmem:[%s530_s3 + $0x68] sm:$0xff] }
   0xb   :  { %351 = vmatprep.subr.bf16.mxu1 %v372_v0  ;;  %v343_v45 = vpack.c.bf16 %v36_v41, %v35_v40  ;;  %v364_v46 = vpack.c.bf16 %v128_v44, %v127_v43  ;;  %v20_v47 = vld [vmem:[%s531_s0] sm:$0xff]  ;;  %v129_v48 = vld [vmem:[%s530_s3 + $0x70] sm:$0xff]  ;;  %v130_v49 = vld [vmem:[%s530_s3 + $0x78] sm:$0xff] }
   0xc   :  { %329 = vmatpush3.bf16.msra.mxu0 %v328_v14  ;;  %v367_v50 = vpack.c.bf16 %v130_v49, %v129_v48  ;;  %v215_v51 = vld [vmem:[%s532_s2] ss:$0 sm:$0xff] }
   0xd   :  { %330 = vmatprep.subr.bf16.mxu0 %v372_v0  ;;  %v216_v56 = vld [vmem:[%s533_s4] ss:$0 sm:$0xff] }
   0xe   :  { %353 = vmatpush3.bf16.msra.mxu1 %v352_v24 }
   0xf   :  { %354 = vmatprep.subr.bf16.mxu1 %v372_v0 }
  0x10   :  { %332 = vmatpush3.bf16.msra.mxu0 %v331_v21 }
  0x11   :  { %333 = vmatprep.subr.bf16.mxu0 %v372_v0 }
  0x12   :  { %356 = vmatpush3.bf16.msra.mxu1 %v355_v30 }
  0x13   :  { %357 = vmatprep.subr.bf16.mxu1 %v372_v0 }
  0x14   :  { %335 = vmatpush3.bf16.msra.mxu0 %v334_v27 }
  0x15   :  { %336 = vmatprep.subr.bf16.mxu0 %v372_v0 }
  0x16   :  { %359 = vmatpush3.bf16.msra.mxu1 %v358_v36 }
  0x17   :  { %360 = vmatprep.subr.bf16.mxu1 %v372_v0 }
  0x18   :  { %338 = vmatpush3.bf16.msra.mxu0 %v337_v33 }
  0x19   :  { %339 = vmatprep.subr.bf16.mxu0 %v372_v0 }
  0x1a   :  { %362 = vmatpush3.bf16.msra.mxu1 %v361_v42 }
  0x1b   :  { %363 = vmatprep.subr.bf16.mxu1 %v372_v0 }
  0x1c   :  { %341 = vmatpush3.bf16.msra.mxu0 %v340_v39 }
  0x1d   :  { %342 = vmatprep.subr.bf16.mxu0 %v372_v0 }
  0x1e   :  { %365 = vmatpush3.bf16.msra.mxu1 %v364_v46 }
  0x1f   :  { %366 = vmatprep.subr.bf16.mxu1 %v372_v0 }
  0x20   :  { %344 = vmatpush3.bf16.msra.mxu0 %v343_v45 }
  0x22   :  { %368 = vmatpush3.bf16.msra.mxu1 %v367_v50 }
  0x23   :  { %284 = vmatmul.mubr.f32.vlgmr.msra.gmra.mrb[0].mxu0 %v20_v47 }
  0xf6   :  { %v110_v52 = vpop.f32.mrb[0].mxu0 }
  0xf7   :  { %v111_v53 = vadd.f32 %v215_v51, %v110_v52  ;;  %v285_v54 = vpop.f32.mrb[1].mxu0 }
  0xf9   :  { %v114_v55 = vmax.f32 %v111_v53, 0.0 }
  0xfb   :  { %319 = vmatmul.mubr.f32.vlgmr.msra.gmra.mrb[0].mxu1 %v114_v55 }
 0x1ce   :  { %v204_v57 = vpop.f32.mrb[0].mxu1 }
 0x1cf   :  { %v205_v58 = vadd.f32 %v216_v56, %v204_v57  ;;  %v320_v59 = vpop.f32.mrb[1].mxu1 }
 0x1d1   :  { %v208_v60 = vmax.f32 %v205_v58, 0.0 }
 0x1d3   :  { %v209_v61 = vadd.f32 %v208_v60, %v20_v47 }
 0x1d5   :  { %210 = vst [vmem:[%s534_s5] sm:$0xff] %v209_v61 }

</bundles_post_ra>
